<compile_context>
chip_gen: v7x
topology: tpu7x:2x2x1
jax: 0.10.0
libtpu: 0.0.40
codegen_flags: <defaults>
</compile_context>

<pallas_src>
import jax
import jax.numpy as jnp
from jax.experimental import pallas as pl
from jax.experimental.pallas import tpu as pltpu


def _round_up(x, m):
    return ((x + m - 1) // m) * m


def _conv_stats_kernel(x_ref, w_ref, y_ref, stats_ref):
    # x_ref:     (2*C_in, TL)  rows = [even-pixel chans | odd-pixel chans],
    #                          lanes = output pixels (TL multiple of 128).
    # w_ref:     (C_out, 2*C_in) block-diagonal fused conv weight (resident).
    # y_ref:     (C_out, TL)   un-normalized conv output (lane-dense store).
    # stats_ref: (1, C_out, 2) per-tile [sum | sum-of-squares] BN partials.
    x = jnp.maximum(x_ref[...], 0.0)                                  # ReLU (VPU)
    y = jnp.dot(w_ref[...], x, preferred_element_type=jnp.float32)    # single MXU matmul
    y_ref[...] = y
    # Per-tile BN partials; lane reductions use the XLU slot (free here).
    stats_ref[0, :, 0:1] = jnp.sum(y, axis=1, keepdims=True)
    stats_ref[0, :, 1:2] = jnp.sum(y * y, axis=1, keepdims=True)


def factorized_reduce(x, w1, w2, gamma, beta, eps=1e-5):
    """x: (N, C_in, H, W) f32 NCHW.  w1, w2: (C_out//2, C_in, 1, 1).
    gamma, beta: (C_out,).  Returns (N, C_out, H//2, W//2), training-mode BN."""
    N, C_in, H, W = x.shape
    assert H % 2 == 0 and W % 2 == 0, "even spatial dims required (as in DARTS usage)"
    C_half = w1.shape[0]
    C_out = 2 * C_half
    Ho, Wo = H // 2, W // 2
    P = Ho * Wo
    M = N * P
    LANE = 128
    f32 = jnp.float32

    # Stride-2 even/odd pixel gather for the two branches. XLA fuses the
    # slice + concat + transpose (+ pad) into one copy producing a single
    # lane-dense (2*C_in, Mp) slab with output pixels on the lane axis.
    x1 = x[:, :, 0::2, 0::2].astype(f32)                              # (N, C_in, Ho, Wo)
    x2 = x[:, :, 1::2, 1::2].astype(f32)
    xg = jnp.concatenate([x1, x2], axis=1).reshape(N, 2 * C_in, P)    # (N, 2*C_in, P)
    xg = jnp.transpose(xg, (1, 0, 2)).reshape(2 * C_in, M)            # (2*C_in, M)

    # Pixel-axis tile: scale with channel count so each grid step moves ~2 MiB
    # (per-step overhead amortized; ~85%+ of HBM roofline per measured sweeps)
    # while the double-buffered footprint stays far below every generation's
    # VMEM (v7x: 64 MiB physical).
    bytes_per_col = (2 * C_in + C_out) * 4
    TL = _round_up(max(1, (2 * 1024 * 1024) // bytes_per_col), LANE)
    TL = min(TL, 8192)
    TL = min(TL, _round_up(M, LANE))
    Mp = _round_up(M, TL)
    if Mp != M:
        # Zero padded columns: ReLU/matmul keep them zero, so stats are exact.
        xg = jnp.pad(xg, ((0, 0), (0, Mp - M)))
    num_tiles = Mp // TL

    # Block-diagonal fused weight: [[w1m, 0], [0, w2m]] @ [x1; x2]
    #                            == [w1m @ x1 ; w2m @ x2]   (channel concat).
    w1m = w1.reshape(C_half, C_in).astype(f32)
    w2m = w2.reshape(C_half, C_in).astype(f32)
    wt = jnp.zeros((C_out, 2 * C_in), f32)
    wt = wt.at[:C_half, :C_in].set(w1m)
    wt = wt.at[C_half:, C_in:].set(w2m)

    # Explicit VMEM limit: needed on v5e (16 MiB scoped default), capped at
    # 48 MiB so it is always safe on v7x (64 MiB physical VMEM).
    in_blk = 2 * C_in * TL * 4
    out_blk = C_out * TL * 4
    w_blk = C_out * 2 * C_in * 4
    vmem_need = 2 * (in_blk + out_blk + w_blk) + (2 << 20)            # double-buffered
    vmem_limit = int(min(max(2 * vmem_need, 16 << 20), 48 << 20))

    cparams = pltpu.CompilerParams(
        dimension_semantics=("parallel",),   # shard pixel tiles across v7x's 2 TCs
        vmem_limit_bytes=vmem_limit,
    )

    y, stats = pl.pallas_call(
        _conv_stats_kernel,
        out_shape=(
            jax.ShapeDtypeStruct((C_out, Mp), f32),
            jax.ShapeDtypeStruct((num_tiles, C_out, 2), f32),
        ),
        grid=(num_tiles,),
        in_specs=[
            pl.BlockSpec((2 * C_in, TL), lambda i: (0, i)),
            pl.BlockSpec((C_out, 2 * C_in), lambda i: (0, 0)),        # resident weight
        ],
        out_specs=(
            pl.BlockSpec((C_out, TL), lambda i: (0, i)),
            pl.BlockSpec((1, C_out, 2), lambda i: (i, 0, 0)),
        ),
        compiler_params=cparams,
    )(xg, wt)

    # Combine tiny per-tile partials; fold BN (training mode, biased variance)
    # into per-channel scale/shift.
    sums = jnp.sum(stats[:, :, 0], axis=0)                            # (C_out,)
    sumsq = jnp.sum(stats[:, :, 1], axis=0)
    mean = sums / M
    var = jnp.maximum(sumsq / M - mean * mean, 0.0)
    inv = jax.lax.rsqrt(var + eps)
    scale = gamma.astype(f32) * inv
    shift = beta.astype(f32) - mean * scale

    # Apply scale/shift in the wrapper: XLA fuses it into the single
    # (C_out, N*P) -> NCHW transpose copy, so the y intermediate crosses HBM
    # only once more (the previous second pallas pass is gone).
    out = y[:, :M] * scale[:, None] + shift[:, None]
    out = out.reshape(C_out, N, Ho, Wo)
    return jnp.transpose(out, (1, 0, 2, 3))


def _reference(x, w1, w2, gamma, beta, eps=1e-5):
    # Pure-JAX reference of the PyTorch forward (training-mode BN).
    xr = jnp.maximum(x, 0.0)
    y1 = jax.lax.conv_general_dilated(xr, w1, (2, 2), 'VALID',
                                      dimension_numbers=('NCHW', 'OIHW', 'NCHW'))
    y2 = jax.lax.conv_general_dilated(xr[:, :, 1:, 1:], w2, (2, 2), 'VALID',
                                      dimension_numbers=('NCHW', 'OIHW', 'NCHW'))
    y = jnp.concatenate([y1, y2], axis=1)
    mean = jnp.mean(y, axis=(0, 2, 3), keepdims=True)
    var = jnp.mean((y - mean) ** 2, axis=(0, 2, 3), keepdims=True)
    g = gamma.reshape(1, -1, 1, 1)
    b = beta.reshape(1, -1, 1, 1)
    return (y - mean) * jax.lax.rsqrt(var + eps) * g + b


if __name__ == "__main__":
    N, C_in, H, W = 2, 4, 16, 16
    C_out = 8
    C_half = C_out // 2

    key = jax.random.PRNGKey(0)
    kx, k1, k2 = jax.random.split(key, 3)
    x = jax.random.normal(kx, (N, C_in, H, W), dtype=jnp.float32)
    # Conv2d(C_in, C_out//2, 1, stride=2, bias=False) weights: (C_half, C_in, 1, 1)
    w1 = jax.random.normal(k1, (C_half, C_in, 1, 1), dtype=jnp.float32) * 0.1
    w2 = jax.random.normal(k2, (C_half, C_in, 1, 1), dtype=jnp.float32) * 0.1
    # BatchNorm2d(affine=True) init: gamma=1, beta=0
    gamma = jnp.ones((C_out,), dtype=jnp.float32)
    beta = jnp.zeros((C_out,), dtype=jnp.float32)

    fr = jax.jit(factorized_reduce)
    out = fr(x, w1, w2, gamma, beta)
    jax.block_until_ready(out)

    ref = _reference(x, w1, w2, gamma, beta)
    assert out.shape == (N, C_out, H // 2, W // 2), out.shape
    assert jnp.allclose(out, ref, atol=1e-4, rtol=1e-4), float(jnp.max(jnp.abs(out - ref)))

    print("KERNEL_OK")
</pallas_src>

<mosaic_0001>
module attributes {stable_mosaic.version = 11 : i64} {
  func.func @_conv_stats_kernel(%arg0: i32, %arg1: memref<8x128xf32, #tpu.memory_space<vmem>>, %arg2: memref<8x8xf32, #tpu.memory_space<vmem>>, %arg3: memref<8x128xf32, #tpu.memory_space<vmem>>, %arg4: memref<1x8x2xf32, #tpu.memory_space<vmem>>) attributes {dimension_semantics = [#tpu.dimension_semantics<parallel>], iteration_bounds = array<i64: 1>, scalar_prefetch = 0 : i64, scratch_operands = 0 : i64, tpu.core_type = #tpu.core_type<tc>, window_params = [{transform_indices = @transform_0, window_bounds = array<i64: 8, 128>}, {pipeline_mode = #tpu.pipeline_mode<synchronous>, transform_indices = @transform_1, window_bounds = array<i64: 8, 8>}, {transform_indices = @transform_2, window_bounds = array<i64: 8, 128>}, {transform_indices = @transform_3, window_bounds = array<i64: 1, 8, 2>}]} {
    %c0 = arith.constant 0 : index
    %c0_0 = arith.constant 0 : index
    %0 = vector.load %arg1[%c0, %c0_0] : memref<8x128xf32, #tpu.memory_space<vmem>>, vector<8x128xf32>
    %cst = arith.constant 0.000000e+00 : f32
    %1 = vector.broadcast %cst : f32 to vector<8x128xf32>
    %2 = arith.maximumf %0, %1 : vector<8x128xf32>
    %c0_1 = arith.constant 0 : index
    %c0_2 = arith.constant 0 : index
    %3 = vector.load %arg2[%c0_1, %c0_2] : memref<8x8xf32, #tpu.memory_space<vmem>>, vector<8x8xf32>
    %cst_3 = arith.constant dense<0.000000e+00> : vector<8x128xf32>
    %4 = tpu.matmul %3, %2, %cst_3 {dimension_numbers = #tpu.dot_dimension_numbers<[1], [0], [0], [1], [0, 0, 1, 1], [], []>} : vector<8x8xf32>, vector<8x128xf32>, vector<8x128xf32> -> vector<8x128xf32>
    %c0_4 = arith.constant 0 : index
    %c0_5 = arith.constant 0 : index
    %5 = vector.load %arg3[%c0_4, %c0_5] : memref<8x128xf32, #tpu.memory_space<vmem>>, vector<8x128xf32>
    tpu.vector_store %arg3[%c0_4, %c0_5], %4 {strides = array<i32>} : memref<8x128xf32, #tpu.memory_space<vmem>>, vector<8x128xf32>,
    %cst_6 = arith.constant dense<0.000000e+00> : vector<8xf32>
    %6 = vector.multi_reduction <add>, %4, %cst_6 [1] : vector<8x128xf32> to vector<8xf32>
    %7 = vector.shape_cast %6 : vector<8xf32> to vector<8x1xf32>
    %c0_7 = arith.constant 0 : index
    %c0_8 = arith.constant 0 : index
    %c0_9 = arith.constant 0 : index
    %8 = vector.load %arg4[%c0_7, %c0_8, %c0_9] : memref<1x8x2xf32, #tpu.memory_space<vmem>>, vector<1x8x1xf32>
    %9 = vector.shape_cast %8 : vector<1x8x1xf32> to vector<8x1xf32>
    %10 = vector.shape_cast %7 : vector<8x1xf32> to vector<1x8x1xf32>
    tpu.vector_store %arg4[%c0_7, %c0_8, %c0_9], %10 {strides = array<i32>} : memref<1x8x2xf32, #tpu.memory_space<vmem>>, vector<1x8x1xf32>,
    %11 = arith.mulf %4, %4 : vector<8x128xf32>
    %cst_10 = arith.constant dense<0.000000e+00> : vector<8xf32>
    %12 = vector.multi_reduction <add>, %11, %cst_10 [1] : vector<8x128xf32> to vector<8xf32>
    %13 = vector.shape_cast %12 : vector<8xf32> to vector<8x1xf32>
    %c0_11 = arith.constant 0 : index
    %c0_12 = arith.constant 0 : index
    %c1 = arith.constant 1 : index
    %14 = vector.load %arg4[%c0_11, %c0_12, %c1] : memref<1x8x2xf32, #tpu.memory_space<vmem>>, vector<1x8x1xf32>
    %15 = vector.shape_cast %14 : vector<1x8x1xf32> to vector<8x1xf32>
    %16 = vector.shape_cast %13 : vector<8x1xf32> to vector<1x8x1xf32>
    tpu.vector_store %arg4[%c0_11, %c0_12, %c1], %16 {strides = array<i32>} : memref<1x8x2xf32, #tpu.memory_space<vmem>>, vector<1x8x1xf32>,
    return
  }
  func.func @transform_0(%arg0: i32) -> (i32, i32) {
    %c0_i32 = arith.constant 0 : i32
    %c0_i32_0 = arith.constant 0 : i32
    return %c0_i32, %arg0 : i32, i32
  }
  func.func @transform_1(%arg0: i32) -> (i32, i32) {
    %c0_i32 = arith.constant 0 : i32
    %c0_i32_0 = arith.constant 0 : i32
    %c0_i32_1 = arith.constant 0 : i32
    return %c0_i32, %c0_i32_0 : i32, i32
  }
  func.func @transform_2(%arg0: i32) -> (i32, i32) {
    %c0_i32 = arith.constant 0 : i32
    %c0_i32_0 = arith.constant 0 : i32
    return %c0_i32, %arg0 : i32, i32
  }
  func.func @transform_3(%arg0: i32) -> (i32, i32, i32) {
    %c0_i32 = arith.constant 0 : i32
    %c0_i32_0 = arith.constant 0 : i32
    %c0_i32_1 = arith.constant 0 : i32
    return %arg0, %c0_i32, %c0_i32_0 : i32, i32, i32
  }
}

</mosaic_0001>

<bundles_post_ra>
// kernel: factorized_reduce.1
= control target key start
LH: loop header
LB: loop body
LE: loop exit
PB: predicated region body
PF: predicated region fallthrough
CT: control target
= control target key end

     0   :  { %v118_v0 = vmov 0.0   ;;  %vm119_vm0 = vmmov 0   ;;  %vm16_vm1 = vcmask 64512   ;;  %vm93_vm2 = vcmask 7168   ;;  %s155_s0 = inlined_call_operand.vmem [shape: f32[8,128], index: 0, kind: input, shape index: {}]   ;;  %s156_s1 = inlined_call_operand.vmem [shape: f32[8,8], index: 1, kind: input, shape index: {}]   ;;  %s157_s2 = inlined_call_operand.vmem [shape: f32[8,128], index: 2, kind: output, shape index: {0}]   ;;  %s158_s3 = inlined_call_operand.vmem [shape: f32[1,8,2], index: 3, kind: output, shape index: {1}]  }
   0x1   :  { %111 = vmatprep.subr.mxu0 %v118_v0  ;;  %v13_v1 = vld [vmem:[%s155_s0] sm:$0xff]  ;;  %113 = vmatprep.mubr.msk.f32.mxu0 %vm119_vm0, %v118_v0  ;;  %vm98_vm3 = vcmask 15368  }
   0x2   :  { %v14_v2 = vmax.f32 %v13_v1, 0.0  ;;  %v15_v3 = vld [vmem:[%s156_s1] sm:$0xff] }
   0x4   :  { %112 = vmatpush3.msra.mxu0 %v14_v2 }
   0x5   :  { %114 = vmatmul.mubr.msk.f32.vlgmr.msra.gmra.mrb[0].mxu0 %vm16_vm1, %v15_v3 }
  0xd8   :  { %v86_v4 = vpop.f32.mrb[0].mxu0 }
  0xd9   :  { %90 = vst [vmem:[%s157_s2] sm:$0xff] %v86_v4  ;;  %91 = vadd.xlane.f32.xlu0 %v86_v4  ;;  %v115_v5 = vpop.f32.mrb[1].mxu0  ;;  %v95_v6 = vmul.f32 %v86_v4, %v86_v4 }
  0xdd   :  { %96 = vadd.xlane.f32.xlu0 %v95_v6 }
 0x166   :  { %v92_v7 = vpop.xlane.xlu0 %91 }
 0x167   :  { %94 = vst.msk [vmem:[%s158_s3] sm:$0xff] %vm93_vm2, %v92_v7 }
 0x16a   :  { %v97_v8 = vpop.xlane.xlu0 %96 }
 0x16b   :  { %99 = vst.msk [vmem:[%s158_s3] sm:$0xff] %vm98_vm3, %v97_v8 }

</bundles_post_ra>
